<compile_context>
chip_gen: v5e
topology: v5e:2x2
jax: 0.10.0
libtpu: 0.0.40
codegen_flags: <defaults>
</compile_context>

<pallas_src>
import functools

import jax
import jax.numpy as jnp
from jax.experimental import pallas as pl
from jax.experimental.pallas import tpu as pltpu


def _round_up(x, m):
    return (x + m - 1) // m * m


def _mm_kernel(v_ref, a_ref, t_ref,
               wv_ref, bv_ref,
               wa_ref, ba_ref,
               wt_ref, bt_ref,
               wc_ref, bc_ref,
               wf_ref, bf_ref,
               o_ref):
    f32 = jnp.float32
    bf16 = jnp.bfloat16

    # Modality encoders: relu(x @ W + b).  Inputs arrive as f32 blocks and are
    # cast to bf16 here (VPU cast hidden under the DMA); MXU accumulates f32.
    v = jnp.dot(v_ref[...].astype(bf16), wv_ref[...], preferred_element_type=f32)
    v = jnp.maximum(v + bv_ref[...], 0.0)

    a = jnp.dot(a_ref[...].astype(bf16), wa_ref[...], preferred_element_type=f32)
    a = jnp.maximum(a + ba_ref[...], 0.0)

    t = jnp.dot(t_ref[...].astype(bf16), wt_ref[...], preferred_element_type=f32)
    t = jnp.maximum(t + bt_ref[...], 0.0)

    # combined_fc on concat([v, a, t]) == v@Wc[0:32] + a@Wc[32:64] + t@Wc[64:96]
    # (static slices of the resident weight ref; avoids an in-kernel concat).
    c = (jnp.dot(v.astype(bf16), wc_ref[0:32, :], preferred_element_type=f32)
         + jnp.dot(a.astype(bf16), wc_ref[32:64, :], preferred_element_type=f32)
         + jnp.dot(t.astype(bf16), wc_ref[64:96, :], preferred_element_type=f32))
    c = jnp.maximum(c + bc_ref[...], 0.0)

    # TODO(synk): nn.Dropout(0.5) is treated as eval-mode identity (no RNG mask).

    # final_fc (zero-padded to 128 lane-dense output columns) + sigmoid.
    logits = jnp.dot(c.astype(bf16), wf_ref[...], preferred_element_type=f32)
    logits = logits + bf_ref[...]
    out = jax.nn.sigmoid(logits)
    # bf16 writeback halves output HBM traffic; padded rows/cols sliced outside.
    o_ref[...] = jnp.broadcast_to(out, o_ref.shape).astype(o_ref.dtype)


@functools.partial(jax.jit, static_argnames=("block_batch",))
def multimodal_maml_forward(video, audio, text, params, *, block_batch=1024):
    """Fused forward. Inputs: video [B,128], audio [B,40], text [B,768].
    1-D inputs are promoted to batch 1; batch-1 modalities broadcast against
    the max batch inside the kernel (mirroring the PyTorch module's expand)."""
    def as2d(x):
        return x[None, :] if x.ndim == 1 else x

    video, audio, text = as2d(video), as2d(audio), as2d(text)
    batch = max(video.shape[0], audio.shape[0], text.shape[0])

    # Batch tiling: no wrapper-side padding of the activations.  Keep at least
    # two grid steps for medium/large batches so v7x can use both TensorCores,
    # round the tile to 16 rows (bf16 sublane packing of intermediates).
    tb = _round_up(batch, 8)
    if tb > 16:
        tb = min(block_batch, _round_up(-(-batch // 2), 16))
    grid = (pl.cdiv(batch, tb),)

    (wv, bv, wa, ba, wt, bt, wc, bc, wf, bf) = params

    n_out = wf.shape[1]
    n_out_pad = 128  # lane-dense output block; extra columns sliced off below
    wf_p = jnp.zeros((wf.shape[0], n_out_pad), jnp.float32).at[:, :n_out].set(wf)
    bf_p = jnp.zeros((n_out_pad,), jnp.float32).at[:n_out].set(bf)

    def prep_modality(x):
        feat = x.shape[1]
        if x.shape[0] == 1 and batch > 1:
            # Keep [1, D] resident; broadcast happens for free in-kernel.
            return x, pl.BlockSpec((1, feat), lambda i: (0, 0))
        if x.shape[0] != batch:
            # PyTorch's expand() only broadcasts size-1 dims; anything else errors.
            raise ValueError("modality batch sizes must be equal or 1")
        return x, pl.BlockSpec((tb, feat), lambda i: (i, 0))

    (video, v_spec) = prep_modality(video)
    (audio, a_spec) = prep_modality(audio)
    (text, t_spec) = prep_modality(text)

    def weight(w):   # bf16 weights, resident across the whole grid (tiny)
        w = w.astype(jnp.bfloat16)
        return w, pl.BlockSpec(w.shape, lambda i: (0, 0))

    def bias(b):     # biases kept in f32 (added after f32 accumulation)
        b = b.astype(jnp.float32)[None, :]
        return b, pl.BlockSpec(b.shape, lambda i: (0, 0))

    wv, wv_spec = weight(wv); bv, bv_spec = bias(bv)
    wa, wa_spec = weight(wa); ba, ba_spec = bias(ba)
    wt, wt_spec = weight(wt); bt, bt_spec = bias(bt)
    wc, wc_spec = weight(wc); bc, bc_spec = bias(bc)
    wf_p, wf_spec = weight(wf_p); bf_p, bf_spec = bias(bf_p)

    operands = (video, audio, text,
                wv, bv, wa, ba, wt, bt, wc, bc, wf_p, bf_p)
    in_specs = [v_spec, a_spec, t_spec,
                wv_spec, bv_spec, wa_spec, ba_spec, wt_spec, bt_spec,
                wc_spec, bc_spec, wf_spec, bf_spec]

    flops = 2 * batch * (128 * 32 + 40 * 32 + 768 * 32 + 96 * 32
                         + 32 * n_out_pad)
    bytes_accessed = (sum(int(x.size) * x.dtype.itemsize for x in operands)
                      + batch * n_out_pad * 2)
    cost = pl.CostEstimate(flops=flops,
                           transcendentals=batch * n_out_pad,
                           bytes_accessed=bytes_accessed)

    out = pl.pallas_call(
        _mm_kernel,
        grid=grid,
        out_shape=jax.ShapeDtypeStruct((batch, n_out_pad), jnp.bfloat16),
        in_specs=in_specs,
        out_specs=pl.BlockSpec((tb, n_out_pad), lambda i: (i, 0)),
        compiler_params=pltpu.CompilerParams(
            dimension_semantics=("parallel",),      # v7x: shard tiles on 2 TCs
            vmem_limit_bytes=32 * 1024 * 1024),     # safe on v5e/v6e/v7x
        cost_estimate=cost,
    )(*operands)

    return out[:, :n_out].astype(jnp.float32)


def init_params(key):
    """Deterministic parameter init matching nn.Linear shapes.
    Weights stored as [in_features, out_features]."""
    dims = [
        ("video_fc", 128, 32),
        ("audio_fc", 40, 32),
        ("text_fc", 768, 32),
        ("combined_fc", 96, 32),
        ("final_fc", 32, 5),
    ]
    params = []
    for i, (_, fan_in, fan_out) in enumerate(dims):
        kw, kb = jax.random.split(jax.random.fold_in(key, i))
        bound = 1.0 / jnp.sqrt(fan_in)
        w = jax.random.uniform(kw, (fan_in, fan_out), jnp.float32, -bound, bound)
        b = jax.random.uniform(kb, (fan_out,), jnp.float32, -bound, bound)
        params.extend([w, b])
    return tuple(params)


def reference_forward(video, audio, text, params):
    """Plain-JAX f32 reference of the PyTorch forward (dropout = eval identity)."""
    (wv, bv, wa, ba, wt, bt, wc, bc, wf, bf) = params
    v = jax.nn.relu(video @ wv + bv)
    a = jax.nn.relu(audio @ wa + ba)
    t = jax.nn.relu(text @ wt + bt)
    comb = jnp.concatenate([v, a, t], axis=1)
    comb = jax.nn.relu(comb @ wc + bc)
    return jax.nn.sigmoid(comb @ wf + bf)


if __name__ == "__main__":
    key = jax.random.PRNGKey(0)
    kp, kv, ka, kt = jax.random.split(key, 4)

    params = init_params(kp)

    batch = 4
    video = jax.random.normal(kv, (batch, 128), jnp.float32)
    audio = jax.random.normal(ka, (batch, 40), jnp.float32)
    text = jax.random.normal(kt, (batch, 768), jnp.float32)

    out = multimodal_maml_forward(video, audio, text, params)
    out = jax.block_until_ready(out)

    ref = reference_forward(video, audio, text, params)
    assert out.shape == (batch, 5)
    # bf16 matmul operands + bf16 output store (f32 accumulation) -> loosened
    # tolerance vs f32 reference.
    assert jnp.allclose(out, ref, atol=2e-2, rtol=2e-2), "mismatch vs reference"

    print("KERNEL_OK")
</pallas_src>

<mosaic_0001>
module attributes {stable_mosaic.version = 11 : i64} {
  func.func @_mm_kernel(%arg0: i32, %arg1: memref<8x128xf32, #tpu.memory_space<vmem>>, %arg2: memref<8x40xf32, #tpu.memory_space<vmem>>, %arg3: memref<8x768xf32, #tpu.memory_space<vmem>>, %arg4: memref<128x32xbf16, #tpu.memory_space<vmem>>, %arg5: memref<1x32xf32, #tpu.memory_space<vmem>>, %arg6: memref<40x32xbf16, #tpu.memory_space<vmem>>, %arg7: memref<1x32xf32, #tpu.memory_space<vmem>>, %arg8: memref<768x32xbf16, #tpu.memory_space<vmem>>, %arg9: memref<1x32xf32, #tpu.memory_space<vmem>>, %arg10: memref<96x32xbf16, #tpu.memory_space<vmem>>, %arg11: memref<1x32xf32, #tpu.memory_space<vmem>>, %arg12: memref<32x128xbf16, #tpu.memory_space<vmem>>, %arg13: memref<1x128xf32, #tpu.memory_space<vmem>>, %arg14: memref<8x128xbf16, #tpu.memory_space<vmem>>) attributes {dimension_semantics = [#tpu.dimension_semantics<parallel>], iteration_bounds = array<i64: 1>, scalar_prefetch = 0 : i64, scratch_operands = 0 : i64, tpu.core_type = #tpu.core_type<tc>, window_params = [{transform_indices = @transform_0, window_bounds = array<i64: 8, 128>}, {transform_indices = @transform_1, window_bounds = array<i64: 8, 40>}, {transform_indices = @transform_2, window_bounds = array<i64: 8, 768>}, {pipeline_mode = #tpu.pipeline_mode<synchronous>, transform_indices = @transform_3, window_bounds = array<i64: 128, 32>}, {pipeline_mode = #tpu.pipeline_mode<synchronous>, transform_indices = @transform_4, window_bounds = array<i64: 1, 32>}, {pipeline_mode = #tpu.pipeline_mode<synchronous>, transform_indices = @transform_5, window_bounds = array<i64: 40, 32>}, {pipeline_mode = #tpu.pipeline_mode<synchronous>, transform_indices = @transform_6, window_bounds = array<i64: 1, 32>}, {pipeline_mode = #tpu.pipeline_mode<synchronous>, transform_indices = @transform_7, window_bounds = array<i64: 768, 32>}, {pipeline_mode = #tpu.pipeline_mode<synchronous>, transform_indices = @transform_8, window_bounds = array<i64: 1, 32>}, {pipeline_mode = #tpu.pipeline_mode<synchronous>, transform_indices = @transform_9, window_bounds = array<i64: 96, 32>}, {pipeline_mode = #tpu.pipeline_mode<synchronous>, transform_indices = @transform_10, window_bounds = array<i64: 1, 32>}, {pipeline_mode = #tpu.pipeline_mode<synchronous>, transform_indices = @transform_11, window_bounds = array<i64: 32, 128>}, {pipeline_mode = #tpu.pipeline_mode<synchronous>, transform_indices = @transform_12, window_bounds = array<i64: 1, 128>}, {transform_indices = @transform_13, window_bounds = array<i64: 8, 128>}]} {
    %c0 = arith.constant 0 : index
    %c0_0 = arith.constant 0 : index
    %0 = vector.load %arg1[%c0, %c0_0] : memref<8x128xf32, #tpu.memory_space<vmem>>, vector<8x128xf32>
    %1 = arith.truncf %0 : vector<8x128xf32> to vector<8x128xbf16>
    %c0_1 = arith.constant 0 : index
    %c0_2 = arith.constant 0 : index
    %2 = vector.load %arg4[%c0_1, %c0_2] : memref<128x32xbf16, #tpu.memory_space<vmem>>, vector<128x32xbf16>
    %cst = arith.constant dense<0.000000e+00> : vector<8x32xf32>
    %3 = tpu.matmul %1, %2, %cst {dimension_numbers = #tpu.dot_dimension_numbers<[1], [0], [0], [1], [0, 0, 1, 1], [], []>} : vector<8x128xbf16>, vector<128x32xbf16>, vector<8x32xf32> -> vector<8x32xf32>
    %c0_3 = arith.constant 0 : index
    %c0_4 = arith.constant 0 : index
    %4 = vector.load %arg5[%c0_3, %c0_4] : memref<1x32xf32, #tpu.memory_space<vmem>>, vector<1x32xf32>
    %5 = vector.broadcast %4 : vector<1x32xf32> to vector<8x32xf32>
    %6 = arith.addf %3, %5 : vector<8x32xf32>
    %cst_5 = arith.constant 0.000000e+00 : f32
    %7 = vector.broadcast %cst_5 : f32 to vector<8x32xf32>
    %8 = arith.maximumf %6, %7 : vector<8x32xf32>
    %c0_6 = arith.constant 0 : index
    %c0_7 = arith.constant 0 : index
    %9 = vector.load %arg2[%c0_6, %c0_7] : memref<8x40xf32, #tpu.memory_space<vmem>>, vector<8x40xf32>
    %10 = arith.truncf %9 : vector<8x40xf32> to vector<8x40xbf16>
    %c0_8 = arith.constant 0 : index
    %c0_9 = arith.constant 0 : index
    %11 = vector.load %arg6[%c0_8, %c0_9] : memref<40x32xbf16, #tpu.memory_space<vmem>>, vector<40x32xbf16>
    %cst_10 = arith.constant dense<0.000000e+00> : vector<8x32xf32>
    %12 = tpu.matmul %10, %11, %cst_10 {dimension_numbers = #tpu.dot_dimension_numbers<[1], [0], [0], [1], [0, 0, 1, 1], [], []>} : vector<8x40xbf16>, vector<40x32xbf16>, vector<8x32xf32> -> vector<8x32xf32>
    %c0_11 = arith.constant 0 : index
    %c0_12 = arith.constant 0 : index
    %13 = vector.load %arg7[%c0_11, %c0_12] : memref<1x32xf32, #tpu.memory_space<vmem>>, vector<1x32xf32>
    %14 = vector.broadcast %13 : vector<1x32xf32> to vector<8x32xf32>
    %15 = arith.addf %12, %14 : vector<8x32xf32>
    %cst_13 = arith.constant 0.000000e+00 : f32
    %16 = vector.broadcast %cst_13 : f32 to vector<8x32xf32>
    %17 = arith.maximumf %15, %16 : vector<8x32xf32>
    %c0_14 = arith.constant 0 : index
    %c0_15 = arith.constant 0 : index
    %18 = vector.load %arg3[%c0_14, %c0_15] : memref<8x768xf32, #tpu.memory_space<vmem>>, vector<8x768xf32>
    %19 = arith.truncf %18 : vector<8x768xf32> to vector<8x768xbf16>
    %c0_16 = arith.constant 0 : index
    %c0_17 = arith.constant 0 : index
    %20 = vector.load %arg8[%c0_16, %c0_17] : memref<768x32xbf16, #tpu.memory_space<vmem>>, vector<768x32xbf16>
    %cst_18 = arith.constant dense<0.000000e+00> : vector<8x32xf32>
    %21 = tpu.matmul %19, %20, %cst_18 {dimension_numbers = #tpu.dot_dimension_numbers<[1], [0], [0], [1], [0, 0, 1, 1], [], []>} : vector<8x768xbf16>, vector<768x32xbf16>, vector<8x32xf32> -> vector<8x32xf32>
    %c0_19 = arith.constant 0 : index
    %c0_20 = arith.constant 0 : index
    %22 = vector.load %arg9[%c0_19, %c0_20] : memref<1x32xf32, #tpu.memory_space<vmem>>, vector<1x32xf32>
    %23 = vector.broadcast %22 : vector<1x32xf32> to vector<8x32xf32>
    %24 = arith.addf %21, %23 : vector<8x32xf32>
    %cst_21 = arith.constant 0.000000e+00 : f32
    %25 = vector.broadcast %cst_21 : f32 to vector<8x32xf32>
    %26 = arith.maximumf %24, %25 : vector<8x32xf32>
    %27 = arith.truncf %8 : vector<8x32xf32> to vector<8x32xbf16>
    %c0_22 = arith.constant 0 : index
    %c0_23 = arith.constant 0 : index
    %28 = vector.load %arg10[%c0_22, %c0_23] : memref<96x32xbf16, #tpu.memory_space<vmem>>, vector<32x32xbf16>
    %cst_24 = arith.constant dense<0.000000e+00> : vector<8x32xf32>
    %29 = tpu.matmul %27, %28, %cst_24 {dimension_numbers = #tpu.dot_dimension_numbers<[1], [0], [0], [1], [0, 0, 1, 1], [], []>} : vector<8x32xbf16>, vector<32x32xbf16>, vector<8x32xf32> -> vector<8x32xf32>
    %30 = arith.truncf %17 : vector<8x32xf32> to vector<8x32xbf16>
    %c32 = arith.constant 32 : index
    %c0_25 = arith.constant 0 : index
    %31 = vector.load %arg10[%c32, %c0_25] : memref<96x32xbf16, #tpu.memory_space<vmem>>, vector<32x32xbf16>
    %cst_26 = arith.constant dense<0.000000e+00> : vector<8x32xf32>
    %32 = tpu.matmul %30, %31, %cst_26 {dimension_numbers = #tpu.dot_dimension_numbers<[1], [0], [0], [1], [0, 0, 1, 1], [], []>} : vector<8x32xbf16>, vector<32x32xbf16>, vector<8x32xf32> -> vector<8x32xf32>
    %33 = arith.addf %29, %32 : vector<8x32xf32>
    %34 = arith.truncf %26 : vector<8x32xf32> to vector<8x32xbf16>
    %c64 = arith.constant 64 : index
    %c0_27 = arith.constant 0 : index
    %35 = vector.load %arg10[%c64, %c0_27] : memref<96x32xbf16, #tpu.memory_space<vmem>>, vector<32x32xbf16>
    %cst_28 = arith.constant dense<0.000000e+00> : vector<8x32xf32>
    %36 = tpu.matmul %34, %35, %cst_28 {dimension_numbers = #tpu.dot_dimension_numbers<[1], [0], [0], [1], [0, 0, 1, 1], [], []>} : vector<8x32xbf16>, vector<32x32xbf16>, vector<8x32xf32> -> vector<8x32xf32>
    %37 = arith.addf %33, %36 : vector<8x32xf32>
    %c0_29 = arith.constant 0 : index
    %c0_30 = arith.constant 0 : index
    %38 = vector.load %arg11[%c0_29, %c0_30] : memref<1x32xf32, #tpu.memory_space<vmem>>, vector<1x32xf32>
    %39 = vector.broadcast %38 : vector<1x32xf32> to vector<8x32xf32>
    %40 = arith.addf %37, %39 : vector<8x32xf32>
    %cst_31 = arith.constant 0.000000e+00 : f32
    %41 = vector.broadcast %cst_31 : f32 to vector<8x32xf32>
    %42 = arith.maximumf %40, %41 : vector<8x32xf32>
    %43 = arith.truncf %42 : vector<8x32xf32> to vector<8x32xbf16>
    %c0_32 = arith.constant 0 : index
    %c0_33 = arith.constant 0 : index
    %44 = vector.load %arg12[%c0_32, %c0_33] : memref<32x128xbf16, #tpu.memory_space<vmem>>, vector<32x128xbf16>
    %cst_34 = arith.constant dense<0.000000e+00> : vector<8x128xf32>
    %45 = tpu.matmul %43, %44, %cst_34 {dimension_numbers = #tpu.dot_dimension_numbers<[1], [0], [0], [1], [0, 0, 1, 1], [], []>} : vector<8x32xbf16>, vector<32x128xbf16>, vector<8x128xf32> -> vector<8x128xf32>
    %c0_35 = arith.constant 0 : index
    %c0_36 = arith.constant 0 : index
    %46 = vector.load %arg13[%c0_35, %c0_36] : memref<1x128xf32, #tpu.memory_space<vmem>>, vector<1x128xf32>
    %47 = vector.broadcast %46 : vector<1x128xf32> to vector<8x128xf32>
    %48 = arith.addf %45, %47 : vector<8x128xf32>
    %49 = arith.negf %48 : vector<8x128xf32>
    %50 = math.exp %49 : vector<8x128xf32>
    %cst_37 = arith.constant 1.000000e+00 : f32
    %51 = vector.broadcast %cst_37 : f32 to vector<8x128xf32>
    %52 = arith.addf %51, %50 : vector<8x128xf32>
    %53 = arith.divf %51, %52 : vector<8x128xf32>
    %54 = arith.truncf %53 : vector<8x128xf32> to vector<8x128xbf16>
    %c0_38 = arith.constant 0 : index
    %c0_39 = arith.constant 0 : index
    %55 = vector.load %arg14[%c0_38, %c0_39] : memref<8x128xbf16, #tpu.memory_space<vmem>>, vector<8x128xbf16>
    tpu.vector_store %arg14[%c0_38, %c0_39], %54 {strides = array<i32>} : memref<8x128xbf16, #tpu.memory_space<vmem>>, vector<8x128xbf16>,
    return
  }
  func.func @transform_0(%arg0: i32) -> (i32, i32) {
    %c0_i32 = arith.constant 0 : i32
    %c0_i32_0 = arith.constant 0 : i32
    return %arg0, %c0_i32 : i32, i32
  }
  func.func @transform_1(%arg0: i32) -> (i32, i32) {
    %c0_i32 = arith.constant 0 : i32
    %c0_i32_0 = arith.constant 0 : i32
    return %arg0, %c0_i32 : i32, i32
  }
  func.func @transform_2(%arg0: i32) -> (i32, i32) {
    %c0_i32 = arith.constant 0 : i32
    %c0_i32_0 = arith.constant 0 : i32
    return %arg0, %c0_i32 : i32, i32
  }
  func.func @transform_3(%arg0: i32) -> (i32, i32) {
    %c0_i32 = arith.constant 0 : i32
    %c0_i32_0 = arith.constant 0 : i32
    %c0_i32_1 = arith.constant 0 : i32
    return %c0_i32, %c0_i32_0 : i32, i32
  }
  func.func @transform_4(%arg0: i32) -> (i32, i32) {
    %c0_i32 = arith.constant 0 : i32
    %c0_i32_0 = arith.constant 0 : i32
    %c0_i32_1 = arith.constant 0 : i32
    return %c0_i32, %c0_i32_0 : i32, i32
  }
  func.func @transform_5(%arg0: i32) -> (i32, i32) {
    %c0_i32 = arith.constant 0 : i32
    %c0_i32_0 = arith.constant 0 : i32
    %c0_i32_1 = arith.constant 0 : i32
    return %c0_i32, %c0_i32_0 : i32, i32
  }
  func.func @transform_6(%arg0: i32) -> (i32, i32) {
    %c0_i32 = arith.constant 0 : i32
    %c0_i32_0 = arith.constant 0 : i32
    %c0_i32_1 = arith.constant 0 : i32
    return %c0_i32, %c0_i32_0 : i32, i32
  }
  func.func @transform_7(%arg0: i32) -> (i32, i32) {
    %c0_i32 = arith.constant 0 : i32
    %c0_i32_0 = arith.constant 0 : i32
    %c0_i32_1 = arith.constant 0 : i32
    return %c0_i32, %c0_i32_0 : i32, i32
  }
  func.func @transform_8(%arg0: i32) -> (i32, i32) {
    %c0_i32 = arith.constant 0 : i32
    %c0_i32_0 = arith.constant 0 : i32
    %c0_i32_1 = arith.constant 0 : i32
    return %c0_i32, %c0_i32_0 : i32, i32
  }
  func.func @transform_9(%arg0: i32) -> (i32, i32) {
    %c0_i32 = arith.constant 0 : i32
    %c0_i32_0 = arith.constant 0 : i32
    %c0_i32_1 = arith.constant 0 : i32
    return %c0_i32, %c0_i32_0 : i32, i32
  }
  func.func @transform_10(%arg0: i32) -> (i32, i32) {
    %c0_i32 = arith.constant 0 : i32
    %c0_i32_0 = arith.constant 0 : i32
    %c0_i32_1 = arith.constant 0 : i32
    return %c0_i32, %c0_i32_0 : i32, i32
  }
  func.func @transform_11(%arg0: i32) -> (i32, i32) {
    %c0_i32 = arith.constant 0 : i32
    %c0_i32_0 = arith.constant 0 : i32
    %c0_i32_1 = arith.constant 0 : i32
    return %c0_i32, %c0_i32_0 : i32, i32
  }
  func.func @transform_12(%arg0: i32) -> (i32, i32) {
    %c0_i32 = arith.constant 0 : i32
    %c0_i32_0 = arith.constant 0 : i32
    %c0_i32_1 = arith.constant 0 : i32
    return %c0_i32, %c0_i32_0 : i32, i32
  }
  func.func @transform_13(%arg0: i32) -> (i32, i32) {
    %c0_i32 = arith.constant 0 : i32
    %c0_i32_0 = arith.constant 0 : i32
    return %arg0, %c0_i32 : i32, i32
  }
}

</mosaic_0001>

<bundles_post_ra>
// kernel: multimodal_maml_forward.1
= control target key start
LH: loop header
LB: loop body
LE: loop exit
PB: predicated region body
PF: predicated region fallthrough
CT: control target
= control target key end

     0   :  { %vm159_vm0 = vcmask 1043456   ;;  %vm155_vm1 = vcmask 326656   ;;  %vm707_vm2 = vcmask 261120   ;;  %vm851_vm7 = vcmask 1041408   ;;  %s1566_s0 = inlined_call_operand.vmem [shape: f32[4,128], index: 0, kind: input, shape index: {}]   ;;  %s1567_s1 = inlined_call_operand.vmem [shape: f32[4,40], index: 1, kind: input, shape index: {}]   ;;  %s1568_s2 = inlined_call_operand.vmem [shape: f32[4,768], index: 2, kind: input, shape index: {}]   ;;  %s1569_s3 = inlined_call_operand.vmem [shape: bf16[128,32], index: 3, kind: input, shape index: {}]   ;;  %s1570_s4 = inlined_call_operand.vmem [shape: f32[1,32], index: 4, kind: input, shape index: {}]   ;;  %s1571_s5 = inlined_call_operand.vmem [shape: bf16[40,32], index: 5, kind: input, shape index: {}]   ;;  %s1572_s6 = inlined_call_operand.vmem [shape: f32[1,32], index: 6, kind: input, shape index: {}]   ;;  %s1573_s7 = inlined_call_operand.vmem [shape: bf16[768,32], index: 7, kind: input, shape index: {}]   ;;  %s1574_s8 = inlined_call_operand.vmem [shape: f32[1,32], index: 8, kind: input, shape index: {}]   ;;  %s1575_s9 = inlined_call_operand.vmem [shape: bf16[96,32], index: 9, kind: input, shape index: {}]   ;;  %s1576_s10 = inlined_call_operand.vmem [shape: f32[1,32], index: 10, kind: input, shape index: {}]   ;;  %s1577_s11 = inlined_call_operand.vmem [shape: bf16[32,128], index: 11, kind: input, shape index: {}]   ;;  %s1578_s12 = inlined_call_operand.vmem [shape: f32[1,128], index: 12, kind: input, shape index: {}]   ;;  %s1579_s13 = inlined_call_operand.vmem [shape: bf16[4,128], index: 13, kind: output, shape index: {}]  }
   0x1   :  { %v1181_v0 = vld [vmem:[%s1569_s3 + $0x38] sm:$0xff]  ;;  %v1180_v3 = vld [vmem:[%s1569_s3 + $0x30] sm:$0xff]  ;;  %v1179_v8 = vld [vmem:[%s1569_s3 + $0x28] sm:$0xff] }
   0x2   :  { %v1191_v1 = vld [vmem:[%s1573_s7 + $0x38] sm:$0xff]  ;;  %115 = vmatpush.bf16.msra.mxu0 %v1181_v0  ;;  %v1190_v4 = vld [vmem:[%s1573_s7 + $0x30] sm:$0xff]  ;;  %v1189_v9 = vld [vmem:[%s1573_s7 + $0x28] sm:$0xff] }
   0x3   :  { %v1199_v2 = vld [vmem:[%s1573_s7 + $0x78] sm:$0xff]  ;;  %606 = vmatpush.bf16.msra.mxu2 %v1191_v1  ;;  %v1198_v5 = vld [vmem:[%s1573_s7 + $0x70] sm:$0xff]  ;;  %v1197_v10 = vld [vmem:[%s1573_s7 + $0x68] sm:$0xff] }
   0x4   :  { %619 = vmatpush.bf16.msra.mxu3 %v1199_v2  ;;  %v135_v6 = vld [vmem:[%s1571_s5 + $0x10] sm:$0xf]  ;;  %v1178_v13 = vld [vmem:[%s1569_s3 + $0x20] sm:$0xff]  ;;  %v1183_v16 = vld [vmem:[%s1571_s5 + $0x8] sm:$0xff] }
   0x5   :  { %v149_v7 = vunpack.c.l.b16 %v135_v6  ;;  %v1188_v14 = vld [vmem:[%s1573_s7 + $0x20] sm:$0xff]  ;;  %v180_v18 = vld [vmem:[%s1568_s2 + $0x18] sm:$0xff]  ;;  %v1176_v25 = vld [vmem:[%s1569_s3 + $0x10] sm:$0xff] }
   0x6   :  { %116 = vmatpush.bf16.msra.mxu0 %v1180_v3  ;;  %v1196_v15 = vld [vmem:[%s1573_s7 + $0x60] sm:$0xff]  ;;  %v1177_v19 = vld [vmem:[%s1569_s3 + $0x18] sm:$0xff]  ;;  %191 = vst [vmem:[#allocation1 + $0x1] ss:$2 sm:$0xff] %v180_v18  ;;  %v1186_v26 = vld [vmem:[%s1573_s7 + $0x10] sm:$0xff] }
   0x7   :  { %607 = vmatpush.bf16.msra.mxu2 %v1190_v4  ;;  %v152_v11 = vpack.c.b16 %v149_v7, %v149_v7  ;;  %v177_v17 = vld [vmem:[%s1568_s2] sm:$0xff]  ;;  %v1187_v20 = vld [vmem:[%s1573_s7 + $0x18] sm:$0xff]  ;;  %v178_v27 = vld [vmem:[%s1568_s2 + $0x8] sm:$0xff] }
   0x8   :  { %620 = vmatpush.bf16.msra.mxu3 %v1198_v5  ;;  %189 = vst [vmem:[#allocation1] ss:$2 sm:$0xff] %v177_v17  ;;  %v1195_v21 = vld [vmem:[%s1573_s7 + $0x58] sm:$0xff]  ;;  %v1182_v22 = vld [vmem:[%s1571_s5] sm:$0xff]  ;;  %v1194_v28 = vld [vmem:[%s1573_s7 + $0x50] sm:$0xff] }
   0x9   :  { %v161_v12 = vsel %vm159_vm0, %v152_v11, 0  ;;  %v1207_v23 = vld [vmem:[%s1573_s7 + $0xb8] sm:$0xff]  ;;  %v129_v24 = vld [vmem:[%s1567_s1] sm:$0xff]  ;;  %193 = vst [vmem:[#allocation1 + $0x10] ss:$2 sm:$0xff] %v178_v27  ;;  %v1206_v31 = vld [vmem:[%s1573_s7 + $0xb0] sm:$0xff] }
   0xa   :  { %117 = vmatpush.bf16.msra.mxu0 %v1179_v8  ;;  %168 = vmatpush.bf16.msra.mxu1 %v161_v12  ;;  %v130_v29 = vpack.c.bf16 %v129_v24, %v129_v24  ;;  %v181_v30 = vld [vmem:[%s1568_s2 + $0x20] sm:$0xff]  ;;  %v179_v32 = vld [vmem:[%s1568_s2 + $0x10] sm:$0xff]  ;;  %v1175_v33 = vld [vmem:[%s1569_s3 + $0x8] sm:$0xff] }
   0xb   :  { %608 = vmatpush.bf16.msra.mxu2 %v1189_v9  ;;  %195 = vst [vmem:[#allocation1 + $0x11] ss:$2 sm:$0xff] %v181_v30  ;;  %v1185_v34 = vld [vmem:[%s1573_s7 + $0x8] sm:$0xff]  ;;  %v1174_v38 = vld [vmem:[%s1569_s3] sm:$0xff]  ;;  %v1215_v42 = vld [vmem:[%s1573_s7 + $0xf8] sm:$0xff] }
   0xc   :  { %621 = vmatpush.bf16.msra.mxu3 %v1197_v10  ;;  %v1193_v35 = vld [vmem:[%s1573_s7 + $0x48] sm:$0xff]  ;;  %197 = vst [vmem:[#allocation1 + $0x20] ss:$2 sm:$0xff] %v179_v32  ;;  %v1184_v39 = vld [vmem:[%s1573_s7] sm:$0xff]  ;;  %v1223_v45 = vld [vmem:[%s1573_s7 + $0x138] sm:$0xff] }
   0xd   :  { %v182_v36 = vld [vmem:[%s1568_s2 + $0x28] sm:$0xff]  ;;  %v1192_v40 = vld [vmem:[%s1573_s7 + $0x40] sm:$0xff]  ;;  %v1231_v46 = vld [vmem:[%s1573_s7 + $0x178] sm:$0xff] }
   0xe   :  { %118 = vmatpush.bf16.msra.mxu0 %v1178_v13  ;;  %169 = vmatpush.bf16.msra.mxu1 %v1183_v16  ;;  %199 = vst [vmem:[#allocation1 + $0x21] ss:$2 sm:$0xff] %v182_v36  ;;  %v1205_v37 = vld [vmem:[%s1573_s7 + $0xa8] sm:$0xff]  ;;  %v45_v44 = vld [vmem:[%s1566_s0] sm:$0xff]  ;;  %v1214_v51 = vld [vmem:[%s1573_s7 + $0xf0] sm:$0xff] }
   0xf   :  { %609 = vmatpush.bf16.msra.mxu2 %v1188_v14  ;;  %v200_v41 = vld.sshfl [vmem:[#allocation1] sm:$0xff pattern:$0x75316420]  ;;  %v201_v43 = vld.sshfl [vmem:[#allocation1 + $0x8] sm:$0xff pattern:$0x75316420]  ;;  %v46_v50 = vpack.c.bf16 %v45_v44, %v45_v44 }
  0x10   :  { %622 = vmatpush.bf16.msra.mxu3 %v1196_v15  ;;  %v1204_v47 = vld [vmem:[%s1573_s7 + $0xa0] sm:$0xff]  ;;  %v212_v48 = vpack.c.bf16 %v200_v41, %v200_v41  ;;  %v213_v49 = vpack.c.bf16 %v201_v43, %v201_v43  ;;  %v1222_v52 = vld [vmem:[%s1573_s7 + $0x130] sm:$0xff]  ;;  %v1203_v54 = vld [vmem:[%s1573_s7 + $0x98] sm:$0xff] }
  0x11   :  { %v1230_v53 = vld [vmem:[%s1573_s7 + $0x170] sm:$0xff]  ;;  %v1213_v55 = vld [vmem:[%s1573_s7 + $0xe8] sm:$0xff]  ;;  %v1212_v59 = vld [vmem:[%s1573_s7 + $0xe0] sm:$0xff] }
  0x12   :  { %119 = vmatpush.bf16.msra.mxu0 %v1177_v19  ;;  %170 = vmatpush.bf16.msra.mxu1 %v1182_v22  ;;  %v1221_v56 = vld [vmem:[%s1573_s7 + $0x128] sm:$0xff]  ;;  %v1202_v58 = vld [vmem:[%s1573_s7 + $0x90] sm:$0xff]  ;;  %v1220_v60 = vld [vmem:[%s1573_s7 + $0x120] sm:$0xff] }
  0x13   :  { %610 = vmatpush.bf16.msra.mxu2 %v1187_v20  ;;  %v1229_v57 = vld [vmem:[%s1573_s7 + $0x168] sm:$0xff]  ;;  %v1228_v61 = vld [vmem:[%s1573_s7 + $0x160] sm:$0xff]  ;;  %v1211_v63 = vld [vmem:[%s1573_s7 + $0xd8] sm:$0xff] }
  0x14   :  { %623 = vmatpush.bf16.msra.mxu3 %v1195_v21  ;;  %v1201_v62 = vld [vmem:[%s1573_s7 + $0x88] sm:$0xff]  ;;  %v1219_v0 = vld [vmem:[%s1573_s7 + $0x118] sm:$0xff]  ;;  %v1200_v2 = vld [vmem:[%s1573_s7 + $0x80] sm:$0xff] }
  0x15   :  { %944 = vmatmul.msk.bf16.vlgmr.msra.gmra.mxu1 %vm155_vm1, %v130_v29  ;;  %v1227_v1 = vld [vmem:[%s1573_s7 + $0x158] sm:$0xff]  ;;  %v202_v3 = vld.sshfl [vmem:[#allocation1 + $0x10] sm:$0xff pattern:$0x75316420]  ;;  %v1209_v8 = vld [vmem:[%s1573_s7 + $0xc8] sm:$0xff] }
  0x16   :  { %632 = vmatpush.bf16.msrb.mxu1 %v1207_v23  ;;  %120 = vmatpush.bf16.msra.mxu0 %v1176_v25  ;;  %v1210_v4 = vld [vmem:[%s1573_s7 + $0xd0] sm:$0xff]  ;;  %v214_v7 = vpack.c.bf16 %v202_v3, %v202_v3  ;;  %v1217_v9 = vld [vmem:[%s1573_s7 + $0x108] sm:$0xff]  ;;  %v1208_v11 = vld [vmem:[%s1573_s7 + $0xc0] sm:$0xff] }
  0x17   :  { %611 = vmatpush.bf16.msra.mxu2 %v1186_v26  ;;  %v1218_v5 = vld [vmem:[%s1573_s7 + $0x110] sm:$0xff]  ;;  %v1225_v10 = vld [vmem:[%s1573_s7 + $0x148] sm:$0xff]  ;;  %v1216_v12 = vld [vmem:[%s1573_s7 + $0x100] sm:$0xff] }
  0x18   :  { %624 = vmatpush.bf16.msra.mxu3 %v1194_v28  ;;  %v1226_v6 = vld [vmem:[%s1573_s7 + $0x150] sm:$0xff]  ;;  %v1224_v13 = vld [vmem:[%s1573_s7 + $0x140] sm:$0xff]  ;;  %v203_v14 = vld.sshfl [vmem:[#allocation1 + $0x18] sm:$0xff pattern:$0x75316420] }
  0x19   :  { %v204_v15 = vld.sshfl [vmem:[#allocation1 + $0x20] sm:$0xff pattern:$0x75316420]  ;;  %v205_v16 = vld.sshfl [vmem:[#allocation1 + $0x28] sm:$0xff pattern:$0x75316420]  ;;  %v215_v17 = vpack.c.bf16 %v203_v14, %v203_v14 }
  0x1a   :  { %633 = vmatpush.bf16.msrb.mxu1 %v1206_v31  ;;  %121 = vmatpush.bf16.msra.mxu0 %v1175_v33  ;;  %v216_v18 = vpack.c.bf16 %v204_v15, %v204_v15  ;;  %v217_v19 = vpack.c.bf16 %v205_v16, %v205_v16  ;;  %v1235_v20 = vld [vmem:[%s1575_s9 + $0x18] sm:$0xff]  ;;  %v1234_v21 = vld [vmem:[%s1575_s9 + $0x10] sm:$0xff]  ;;  %v1233_v22 = vld [vmem:[%s1575_s9 + $0x8] sm:$0xff] }
  0x1b   :  { %612 = vmatpush.bf16.msra.mxu2 %v1185_v34  ;;  %v1232_v23 = vld [vmem:[%s1575_s9] sm:$0xff]  ;;  %v1237_v25 = vld [vmem:[%s1575_s9 + $0x28] sm:$0xff] }
  0x1c   :  { %625 = vmatpush.bf16.msra.mxu3 %v1193_v35  ;;  %v1240_v24 = vld [vmem:[%s1572_s6] ss:$0 sm:$0xff] }
  0x1d   :  { %v1241_v30 = vld [vmem:[%s1570_s4] ss:$0 sm:$0xff] }
  0x1e   :  { %634 = vmatpush.bf16.msrb.mxu1 %v1205_v37  ;;  %122 = vmatpush.bf16.msra.mxu0 %v1174_v38  ;;  %v1236_v37 = vld [vmem:[%s1575_s9 + $0x20] sm:$0xff] }
  0x1f   :  { %613 = vmatpush.bf16.msra.mxu2 %v1184_v39  ;;  %v1242_v43 = vld [vmem:[%s1574_s8] ss:$0 sm:$0xff] }
  0x20   :  { %626 = vmatpush.bf16.msra.mxu3 %v1192_v40 }
  0x21   :  { %123 = vmatmul.bf16.vlgmr.msra.gmra.mxu0 %v46_v50 }
  0x22   :  { %645 = vmatpush.bf16.msrb.mxu0 %v1215_v42  ;;  %635 = vmatpush.bf16.msrb.mxu1 %v1204_v47 }
  0x23   :  { %658 = vmatpush.bf16.msrb.mxu2 %v1223_v45  ;;  %627 = vmatmul.bf16.vlgmr.msra.gmra.mxu3 %v213_v49 }
  0x24   :  { %671 = vmatpush.bf16.msrb.mxu3 %v1231_v46  ;;  %614 = vmatmul.bf16.vlgmr.msra.gmra.mxu2 %v212_v48 }
  0x26   :  { %646 = vmatpush.bf16.msrb.mxu0 %v1214_v51  ;;  %636 = vmatpush.bf16.msrb.mxu1 %v1203_v54 }
  0x27   :  { %659 = vmatpush.bf16.msrb.mxu2 %v1222_v52 }
  0x28   :  { %672 = vmatpush.bf16.msrb.mxu3 %v1230_v53 }
  0x2a   :  { %647 = vmatpush.bf16.msrb.mxu0 %v1213_v55  ;;  %637 = vmatpush.bf16.msrb.mxu1 %v1202_v58 }
  0x2b   :  { %660 = vmatpush.bf16.msrb.mxu2 %v1221_v56 }
  0x2c   :  { %673 = vmatpush.bf16.msrb.mxu3 %v1229_v57 }
  0x2e   :  { %648 = vmatpush.bf16.msrb.mxu0 %v1212_v59  ;;  %638 = vmatpush.bf16.msrb.mxu1 %v1201_v62  ;;  %v1239_v59 = vld [vmem:[%s1577_s11 + $0x8] sm:$0xff] }
  0x2f   :  { %661 = vmatpush.bf16.msrb.mxu2 %v1220_v60 }
  0x30   :  { %674 = vmatpush.bf16.msrb.mxu3 %v1228_v61 }
  0x32   :  { %649 = vmatpush.bf16.msrb.mxu0 %v1211_v63  ;;  %639 = vmatpush.bf16.msrb.mxu1 %v1200_v2  ;;  %v1238_v63 = vld [vmem:[%s1577_s11] sm:$0xff] }
  0x33   :  { %662 = vmatpush.bf16.msrb.mxu2 %v1219_v0  ;;  %v1243_v2 = vld [vmem:[%s1576_s10] ss:$0 sm:$0xff] }
  0x34   :  { %675 = vmatpush.bf16.msrb.mxu3 %v1227_v1 }
  0x35   :  { %640 = vmatmul.bf16.vlgmr.msrb.gmra.mxu1 %v214_v7 }
  0x36   :  { %650 = vmatpush.bf16.msrb.mxu0 %v1210_v4  ;;  %717 = vmatpush.bf16.msra.mxu1 %v1235_v20 }
  0x37   :  { %663 = vmatpush.bf16.msrb.mxu2 %v1218_v5 }
  0x38   :  { %676 = vmatpush.bf16.msrb.mxu3 %v1226_v6 }
  0x3a   :  { %651 = vmatpush.bf16.msrb.mxu0 %v1209_v8  ;;  %718 = vmatpush.bf16.msra.mxu1 %v1234_v21 }
  0x3b   :  { %664 = vmatpush.bf16.msrb.mxu2 %v1217_v9  ;;  %v1244_v9 = vld [vmem:[%s1578_s12] ss:$0 sm:$0xff] }
  0x3c   :  { %677 = vmatpush.bf16.msrb.mxu3 %v1225_v10 }
  0x3e   :  { %652 = vmatpush.bf16.msrb.mxu0 %v1208_v11  ;;  %745 = vmatpush.bf16.msrb.mxu1 %v1233_v22 }
  0x3f   :  { %665 = vmatpush.bf16.msrb.mxu2 %v1216_v12 }
  0x40   :  { %678 = vmatpush.bf16.msrb.mxu3 %v1224_v13 }
  0x41   :  { %653 = vmatmul.bf16.vlgmr.msrb.gmra.mxu0 %v215_v17 }
  0x42   :  { %666 = vmatmul.bf16.vlgmr.msrb.gmra.mxu2 %v216_v18  ;;  %746 = vmatpush.bf16.msrb.mxu1 %v1232_v23 }
  0x43   :  { %679 = vmatmul.bf16.vlgmr.msrb.gmra.mxu3 %v217_v19  ;;  %778 = vmatpush.bf16.msra.mxu0 %v1237_v25 }
  0x44   :  { %822 = vmatpush.bf16.msra.mxu2 %v1239_v59 }
  0x47   :  { %779 = vmatpush.bf16.msra.mxu0 %v1236_v37 }
  0x48   :  { %823 = vmatpush.bf16.msra.mxu2 %v1238_v63 }
  0x92   :  { %v172_v26 = vpop.f32.mrf.mxu1 }
  0x93   :  { %v173_v27 = vadd.f32 %v1240_v24, %v172_v26 }
  0x95   :  { %v176_v28 = vmax.f32 %v173_v27, 0.0 }
  0x97   :  { %v690_v29 = vpack.c.bf16 %v176_v28, %v176_v28 }
  0x99   :  { %1145 = vmatmul.msk.bf16.vlgmr.msra.gmra.mxu1 %vm707_vm2, %v690_v29 }
  0x9a   :  { %v174_v31 = vpop.f32.mrf.mxu1 }
  0x9e   :  { %v124_v32 = vpop.f32.mrf.mxu0 }
  0x9f   :  { %v125_v33 = vadd.f32 %v1241_v30, %v124_v32 }
  0xa1   :  { %v128_v34 = vmax.f32 %v125_v33, 0.0 }
  0xa3   :  { %v685_v38 = vpack.c.bf16 %v128_v34, %v128_v34 }
  0xa6   :  { %v628_v36 = vpop.f32.mrf.mxu3  ;;  %v126_v39 = vpop.f32.mrf.mxu0 }
  0xa7   :  { %v615_v35 = vpop.f32.mrf.mxu2 }
  0xa8   :  { %v616_v44 = vadd.f32 %v1242_v43, %v615_v35 }
  0xa9   :  { %1154 = vmatmul.msk.bf16.vlgmr.msrb.gmra.mxu1 %vm707_vm2, %v685_v38 }
  0xaa   :  { %v629_v46 = vadd.f32 %v628_v36, %v616_v44 }
  0xae   :  { %v630_v41 = vpop.f32.mrf.mxu3 }
  0xaf   :  { %v617_v40 = vpop.f32.mrf.mxu2 }
  0xb2   :  { %v641_v42 = vpop.f32.mrf.mxu1 }
  0xb3   :  { %v642_v48 = vadd.f32 %v641_v42, %v629_v46 }
  0xba   :  { %v643_v45 = vpop.f32.mrf.mxu1 }
  0xbe   :  { %v654_v47 = vpop.f32.mrf.mxu0 }
  0xbf   :  { %v655_v49 = vadd.f32 %v654_v47, %v642_v48 }
  0xc5   :  { %v667_v50 = vpop.f32.mrf.mxu2 }
  0xc6   :  { %v680_v51 = vpop.f32.mrf.mxu3  ;;  %v668_v52 = vadd.f32 %v667_v50, %v655_v49  ;;  %v656_v53 = vpop.f32.mrf.mxu0 }
  0xc8   :  { %v681_v54 = vadd.f32 %v680_v51, %v668_v52 }
  0xca   :  { %v684_v55 = vmax.f32 %v681_v54, 0.0 }
  0xcc   :  { %v752_v56 = vpack.c.bf16 %v684_v55, %v684_v55 }
  0xcd   :  { %v669_v57 = vpop.f32.mrf.mxu2 }
  0xce   :  { %v682_v58 = vpop.f32.mrf.mxu3  ;;  %1163 = vmatmul.msk.bf16.vlgmr.msra.gmra.mxu0 %vm707_vm2, %v752_v56 }
 0x116   :  { %v720_v60 = vpop.f32.mrf.mxu1 }
 0x11e   :  { %v722_v61 = vpop.f32.mrf.mxu1 }
 0x126   :  { %v748_v62 = vpop.f32.mrf.mxu1 }
 0x127   :  { %v749_v1 = vadd.f32 %v748_v62, %v720_v60 }
 0x12e   :  { %v750_v0 = vpop.f32.mrf.mxu1 }
 0x14b   :  { %v781_v3 = vpop.f32.mrf.mxu0 }
 0x14c   :  { %v785_v4 = vadd.f32 %v781_v3, %v749_v1 }
 0x14e   :  { %v790_v5 = vadd.f32 %v1243_v2, %v785_v4 }
 0x150   :  { %v791_v6 = vmax.f32 %v790_v5, 0.0 }
 0x152   :  { %v792_v7 = vpack.c.bf16 %v791_v6, %v791_v6 }
 0x153   :  { %v783_v8 = vpop.f32.mrf.mxu0 }
 0x154   :  { %1172 = vmatmul.msk.bf16.vlgmr.msra.gmra.mxu2 %vm707_vm2, %v792_v7 }
 0x1d7   :  { %v825_v10 = vpop.f32.mrf.mxu2 }
 0x1d8   :  { %v826_v11 = vadd.f32 %v1244_v9, %v825_v10 }
 0x1da   :  { %v1173_v12 = vmul.f32 -1.442695, %v826_v11 }
 0x1dc   :  { %1245 = vpow2.f32 %v1173_v12 }
 0x1df   :  { %v827_v13 = vpop.f32.mrf.mxu2 }
 0x1e2   :  { %v1246_v14 = vpop.eup %1245 }
 0x1e3   :  { %v832_v15 = vadd.f32 1.0, %v1246_v14 }
 0x1e5   :  { %1247 = vrcp.f32 %v832_v15  ;;  %v844_v19 = vand.u32 2147483648, %v832_v15  ;;  %v842_v21 = vand.u32 2147483647, %v832_v15  ;;  %vm838_vm4 = vweird.f32 %v832_v15 }
 0x1e7   :  { %v845_v23 = vor.u32 1.1754944e-38, %v844_v19  ;;  %vm843_vm6 = vcmp.eq.f32.partialorder %v842_v21, 8.507059e+37 }
 0x1eb   :  { %v1248_v16 = vpop.eup %1247 }
 0x1ec   :  { %v834_v17 = vmul.f32 %v1248_v16, %v832_v15  ;;  %vm839_vm3 = vweird.f32 %v1248_v16 }
 0x1ed   :  { %vm840_vm5 = vmor %vm838_vm4, %vm839_vm3 }
 0x1ee   :  { %v835_v18 = vsub.f32 1.0, %v834_v17 }
 0x1f0   :  { %v836_v20 = vmul.f32 %v1248_v16, %v835_v18 }
 0x1f2   :  { %v837_v22 = vadd.f32 %v1248_v16, %v836_v20 }
 0x1f4   :  { %v841_v24 = vsel %vm840_vm5, %v1248_v16, %v837_v22 }
 0x1f5   :  { %v846_v25 = vsel %vm843_vm6, %v845_v23, %v841_v24 }
 0x1f6   :  { %v848_v26 = vpack.c.bf16 %v846_v25, %v846_v25 }
 0x1f8   :  { %v850_v27 = vrot.slane %v848_v26, 2 }
 0x1fa   :  { %v854_v28 = vsel %vm851_vm7, %v848_v26, %v850_v27 }
 0x1fb   :  { %861 = vst [vmem:[#allocation2] sm:$0x3] %v854_v28 }
 0x202   :  { %v881_v29 = vld [vmem:[#allocation2] sm:$0x3] }
 0x203   :  { %882 = vst [vmem:[%s1579_s13] sm:$0x3] %v881_v29 }

</bundles_post_ra>
